<compile_context>
chip_gen: v5e
topology: v5e:2x2
jax: 0.10.0
libtpu: 0.0.40
codegen_flags: <defaults>
</compile_context>

<pallas_src>
from dataclasses import dataclass, field
from typing import Any, Dict

import numpy as np
import jax
import jax.numpy as jnp
from jax.experimental import pallas as pl
from jax.experimental.pallas import tpu as pltpu


def _round_up(x: int, m: int) -> int:
    return -(-x // m) * m


# ----------------------------------------------------------------------------
# Pallas kernel: per N-tile, load every input's full channel slab, concatenate
# in registers along the lane dim, and do a single full-width store.
# ----------------------------------------------------------------------------
def _make_concat_kernel(num_inputs: int):
    def kernel(*refs):
        in_refs, o_ref = refs[:num_inputs], refs[num_inputs]
        parts = [r[...].astype(o_ref.dtype) for r in in_refs]
        if len(parts) == 1:
            o_ref[...] = parts[0]
        else:
            o_ref[...] = jnp.concatenate(parts, axis=-1)
    return kernel


def concat_features(feature_list, *, max_tile_n: int = 1024,
                    vmem_budget_bytes: int = 24 * 1024 * 1024):
    """Channel-wise concat of (N, Ci) feature matrices -> (N, sum(Ci))."""
    assert len(feature_list) > 0
    feats = [jnp.asarray(f) for f in feature_list]
    N = int(feats[0].shape[0])
    for f in feats:
        assert f.ndim == 2 and int(f.shape[0]) == N, "inputs must share the point list"
    chans = [int(f.shape[1]) for f in feats]
    c_total = sum(chans)
    out_dtype = jnp.result_type(*[f.dtype for f in feats])

    if len(feats) == 1:                       # trivial concat
        return feats[0].astype(out_dtype)

    # Largest N tile that keeps double-buffered inputs + output under budget
    # (explicit sizing so v7x's 64 MiB VMEM is as safe as v5e/v6e's 128 MiB).
    in_row_bytes = sum(c * np.dtype(f.dtype).itemsize for c, f in zip(chans, feats))
    out_row_bytes = c_total * np.dtype(out_dtype).itemsize
    bytes_per_row = 2 * (in_row_bytes + out_row_bytes)        # x2: double buffering
    tile_n = min(max_tile_n, max(8, vmem_budget_bytes // max(bytes_per_row, 1)))
    tile_n = max(8, (tile_n // 8) * 8)                        # sublane granularity
    tile_n = min(tile_n, _round_up(N, 8))

    grid = (pl.cdiv(N, tile_n),)
    in_specs = [pl.BlockSpec((tile_n, c), lambda i: (i, 0)) for c in chans]
    out_specs = pl.BlockSpec((tile_n, c_total), lambda i: (i, 0))

    return pl.pallas_call(
        _make_concat_kernel(len(feats)),
        out_shape=jax.ShapeDtypeStruct((N, c_total), out_dtype),
        grid_spec=pltpu.PrefetchScalarGridSpec(
            num_scalar_prefetch=0,
            grid=grid,
            in_specs=in_specs,
            out_specs=out_specs,
        ),
        compiler_params=pltpu.CompilerParams(
            dimension_semantics=("parallel",),
            vmem_limit_bytes=32 * 1024 * 1024,
        ),
    )(*feats)


# ----------------------------------------------------------------------------
# SparseTensor + module-level wrapper (metadata bookkeeping is Python-side).
# ----------------------------------------------------------------------------
@dataclass
class SparseTensor:
    F: Any                      # (N, C) features
    C: Any                      # (N, 4) coords (x, y, z, batch)
    s: int = 1                  # tensor stride
    coord_maps: Dict = field(default_factory=dict)
    kernel_maps: Dict = field(default_factory=dict)


def minkowski_concatenation(input_list):
    """Forward pass of MinkowskiConcatenation."""
    assert len(input_list) > 0
    inputs = input_list[0]
    out_features = concat_features([t.F for t in input_list])
    output_tensor = SparseTensor(out_features, inputs.C, inputs.s)
    output_tensor.coord_maps = inputs.coord_maps
    output_tensor.kernel_maps = inputs.kernel_maps
    return output_tensor


# ----------------------------------------------------------------------------
if __name__ == "__main__":
    key = jax.random.PRNGKey(0)
    batches, pts_per_batch, grid_size = 2, 48, 16
    N = batches * pts_per_batch                      # 96 points total

    kc, k0, k1, k2 = jax.random.split(key, 4)

    # Deterministic synthetic sparse point cloud: unique voxels per batch.
    coords_list = []
    for b in range(batches):
        kb = jax.random.fold_in(kc, b)
        flat = jax.random.choice(kb, grid_size ** 3, shape=(pts_per_batch,),
                                 replace=False)
        x = flat // (grid_size * grid_size)
        y = (flat // grid_size) % grid_size
        z = flat % grid_size
        coords_list.append(jnp.stack([x, y, z, jnp.full_like(x, b)], axis=1))
    coords = jnp.concatenate(coords_list, axis=0).astype(jnp.int32)   # (96, 4)

    # Three SparseTensors sharing the same coords; Ctot = 128 -> lane-dense out.
    channels = (32, 64, 32)
    feats = [jax.random.normal(k, (N, c), dtype=jnp.float32)
             for k, c in zip((k0, k1, k2), channels)]
    tensors = [SparseTensor(f, coords, 1) for f in feats]

    out = minkowski_concatenation(tensors)
    jax.block_until_ready(out.F)
    ref = jnp.concatenate(feats, axis=1)
    np.testing.assert_array_equal(np.asarray(out.F), np.asarray(ref))
    assert out.F.shape == (N, sum(channels))
    assert out.C.shape == (N, 4) and out.s == 1

    # Second case: uneven channel widths (unaligned in-register concat path).
    k3, k4 = jax.random.split(k2)
    feats2 = [jax.random.normal(k3, (N, 16), dtype=jnp.float32),
              jax.random.normal(k4, (N, 40), dtype=jnp.float32)]
    out2 = jax.block_until_ready(concat_features(feats2))
    np.testing.assert_array_equal(np.asarray(out2),
                                  np.asarray(jnp.concatenate(feats2, axis=1)))

    print("KERNEL_OK")
</pallas_src>

<mosaic_0001>
module attributes {stable_mosaic.version = 11 : i64} {
  func.func @kernel(%arg0: i32, %arg1: memref<96x32xf32, #tpu.memory_space<vmem>>, %arg2: memref<96x64xf32, #tpu.memory_space<vmem>>, %arg3: memref<96x32xf32, #tpu.memory_space<vmem>>, %arg4: memref<96x128xf32, #tpu.memory_space<vmem>>) attributes {dimension_semantics = [#tpu.dimension_semantics<parallel>], iteration_bounds = array<i64: 1>, scalar_prefetch = 0 : i64, scratch_operands = 0 : i64, tpu.core_type = #tpu.core_type<tc>, window_params = [{transform_indices = @transform_0, window_bounds = array<i64: 96, 32>}, {transform_indices = @transform_1, window_bounds = array<i64: 96, 64>}, {transform_indices = @transform_2, window_bounds = array<i64: 96, 32>}, {transform_indices = @transform_3, window_bounds = array<i64: 96, 128>}]} {
    %c0 = arith.constant 0 : index
    %c0_0 = arith.constant 0 : index
    %0 = vector.load %arg1[%c0, %c0_0] : memref<96x32xf32, #tpu.memory_space<vmem>>, vector<96x32xf32>
    %c0_1 = arith.constant 0 : index
    %c0_2 = arith.constant 0 : index
    %1 = vector.load %arg2[%c0_1, %c0_2] : memref<96x64xf32, #tpu.memory_space<vmem>>, vector<96x64xf32>
    %c0_3 = arith.constant 0 : index
    %c0_4 = arith.constant 0 : index
    %2 = vector.load %arg3[%c0_3, %c0_4] : memref<96x32xf32, #tpu.memory_space<vmem>>, vector<96x32xf32>
    %3 = tpu.concatenate %0, %1, %2 in 1 : vector<96x32xf32>, vector<96x64xf32>, vector<96x32xf32> -> vector<96x128xf32>
    %c0_5 = arith.constant 0 : index
    %c0_6 = arith.constant 0 : index
    %4 = vector.load %arg4[%c0_5, %c0_6] : memref<96x128xf32, #tpu.memory_space<vmem>>, vector<96x128xf32>
    tpu.vector_store %arg4[%c0_5, %c0_6], %3 {strides = array<i32>} : memref<96x128xf32, #tpu.memory_space<vmem>>, vector<96x128xf32>,
    return
  }
  func.func @transform_0(%arg0: i32) -> (i32, i32) {
    %c0_i32 = arith.constant 0 : i32
    %c0_i32_0 = arith.constant 0 : i32
    return %arg0, %c0_i32 : i32, i32
  }
  func.func @transform_1(%arg0: i32) -> (i32, i32) {
    %c0_i32 = arith.constant 0 : i32
    %c0_i32_0 = arith.constant 0 : i32
    return %arg0, %c0_i32 : i32, i32
  }
  func.func @transform_2(%arg0: i32) -> (i32, i32) {
    %c0_i32 = arith.constant 0 : i32
    %c0_i32_0 = arith.constant 0 : i32
    return %arg0, %c0_i32 : i32, i32
  }
  func.func @transform_3(%arg0: i32) -> (i32, i32) {
    %c0_i32 = arith.constant 0 : i32
    %c0_i32_0 = arith.constant 0 : i32
    return %arg0, %c0_i32 : i32, i32
  }
}

</mosaic_0001>

<bundles_post_ra>
// kernel: tpu_custom_call.1
= control target key start
LH: loop header
LB: loop body
LE: loop exit
PB: predicated region body
PF: predicated region fallthrough
CT: control target
= control target key end

     0   :  { %s234_s18 = smov 32   ;;  %s394_s0 = inlined_call_operand.vmem [shape: f32[96,32], index: 0, kind: input, shape index: {}]   ;;  %s395_s1 = inlined_call_operand.vmem [shape: f32[96,64], index: 1, kind: input, shape index: {}]   ;;  %s396_s2 = inlined_call_operand.vmem [shape: f32[96,32], index: 2, kind: input, shape index: {}]   ;;  %s397_s3 = inlined_call_operand.hbm [shape: f32[96,128], index: 3, kind: output, shape index: {}]  }
   0x1   :  { %v31_v0 = vld [vmem:[%s395_s1 + $0x20] sm:$0xff]  ;;  %v29_v1 = vld [vmem:[%s395_s1 + $0x10] sm:$0xff] }
   0x2   :  { %v27_v2 = vld [vmem:[%s395_s1] sm:$0xff]  ;;  %71 = vrot.lane.b32.xlu2 %v31_v0, %s234_s18  ;;  %67 = vrot.lane.b32.xlu1 %v29_v1, %s234_s18 }
   0x3   :  { %63 = vrot.lane.b32.xlu0 %v27_v2, %s234_s18 }
   0x4   :  { %8 = vsyncpa [#allocation3], 0  ;;  %v32_v3 = vld [vmem:[%s395_s1 + $0x28] sm:$0xff]  ;;  %v30_v4 = vld [vmem:[%s395_s1 + $0x18] sm:$0xff]  ;;  %s235_s16 = smov 96   ;;  %vm147_vm0 = vcmask 261120  }
   0x5   :  { %v28_v5 = vld [vmem:[%s395_s1 + $0x8] sm:$0xff]  ;;  %v35_v6 = vld [vmem:[%s395_s1 + $0x40] sm:$0xff]  ;;  %v34_v7 = vld [vmem:[%s395_s1 + $0x38] sm:$0xff]  ;;  %vm160_vm1 = vcmask 785408   ;;  %s236_s27 = smov [#allocation2]   ;;  %s191_s4 = sshll.u32 %s397_s3, 4  ;;  %s192_s4 = int_to_ptr.hbm [resolvable:$true] %s191_s4 }
   0x6   :  { %v33_v8 = vld [vmem:[%s395_s1 + $0x30] sm:$0xff]  ;;  %v38_v9 = vld [vmem:[%s395_s1 + $0x58] sm:$0xff]  ;;  %v36_v11 = vld [vmem:[%s395_s1 + $0x48] sm:$0xff]  ;;  %s189_s28 = sshll.u32 %s236_s27, 4  ;;  %s237_s7 = smov 128   ;;  %s190_s28 = int_to_ptr.vmem [resolvable:$true] %s189_s28 }
   0x7   :  { %v37_v10 = vld [vmem:[%s395_s1 + $0x50] sm:$0xff]  ;;  %v40_v13 = vld [vmem:[%s396_s2 + $0x8] sm:$0xff]  ;;  %v39_v14 = vld [vmem:[%s396_s2] sm:$0xff]  ;;  %s238_s3 = smov 8  }
   0x8   :  { %v41_v12 = vld [vmem:[%s396_s2 + $0x10] sm:$0xff]  ;;  %v44_v15 = vld [vmem:[%s396_s2 + $0x28] sm:$0xff]  ;;  %v43_v16 = vld [vmem:[%s396_s2 + $0x20] sm:$0xff] }
   0x9   :  { %v42_v17 = vld [vmem:[%s396_s2 + $0x18] sm:$0xff]  ;;  %v47_v18 = vld [vmem:[%s396_s2 + $0x40] sm:$0xff]  ;;  %v45_v20 = vld [vmem:[%s396_s2 + $0x30] sm:$0xff] }
   0xa   :  { %73 = vrot.lane.b32.xlu2 %v32_v3, %s234_s18  ;;  %69 = vrot.lane.b32.xlu1 %v30_v4, %s234_s18  ;;  %v46_v19 = vld [vmem:[%s396_s2 + $0x38] sm:$0xff]  ;;  %v49_v22 = vld [vmem:[%s396_s2 + $0x50] sm:$0xff] }
   0xb   :  { %65 = vrot.lane.b32.xlu0 %v28_v5, %s234_s18  ;;  %v50_v21 = vld [vmem:[%s396_s2 + $0x58] sm:$0xff]  ;;  %v48_v23 = vld [vmem:[%s396_s2 + $0x48] sm:$0xff]  ;;  %v17_v30 = vld [vmem:[%s394_s0 + $0x10] sm:$0xff] }
   0xc   :  { %v20_v36 = vld [vmem:[%s394_s0 + $0x28] sm:$0xff]  ;;  %v23_v42 = vld [vmem:[%s394_s0 + $0x40] sm:$0xff]  ;;  %v26_v48 = vld [vmem:[%s394_s0 + $0x58] sm:$0xff] }
   0xd   :  { %v16_v49 = vld [vmem:[%s394_s0 + $0x8] sm:$0xff]  ;;  %v15_v50 = vld [vmem:[%s394_s0] sm:$0xff]  ;;  %v18_v61 = vld [vmem:[%s394_s0 + $0x18] sm:$0xff] }
   0xe   :  { %v19_v60 = vld [vmem:[%s394_s0 + $0x20] sm:$0xff]  ;;  %v22_v4 = vld [vmem:[%s394_s0 + $0x38] sm:$0xff]  ;;  %v21_v5 = vld [vmem:[%s394_s0 + $0x30] sm:$0xff] }
  0x12   :  { %79 = vrot.lane.b32.xlu2 %v35_v6, %s234_s18  ;;  %77 = vrot.lane.b32.xlu1 %v34_v7, %s234_s18 }
  0x13   :  { %75 = vrot.lane.b32.xlu0 %v33_v8, %s234_s18 }
  0x1a   :  { %85 = vrot.lane.b32.xlu2 %v38_v9, %s234_s18  ;;  %83 = vrot.lane.b32.xlu1 %v37_v10, %s234_s18 }
  0x1b   :  { %81 = vrot.lane.b32.xlu0 %v36_v11, %s234_s18 }
  0x22   :  { %115 = vrot.lane.b32.xlu2 %v41_v12, %s235_s16  ;;  %113 = vrot.lane.b32.xlu1 %v40_v13, %s235_s16  ;;  %v25_v12 = vld [vmem:[%s394_s0 + $0x50] sm:$0xff]  ;;  %v24_v13 = vld [vmem:[%s394_s0 + $0x48] sm:$0xff] }
  0x23   :  { %111 = vrot.lane.b32.xlu0 %v39_v14, %s235_s16 }
  0x2a   :  { %121 = vrot.lane.b32.xlu2 %v44_v15, %s235_s16  ;;  %119 = vrot.lane.b32.xlu1 %v43_v16, %s235_s16 }
  0x2b   :  { %117 = vrot.lane.b32.xlu0 %v42_v17, %s235_s16 }
  0x32   :  { %127 = vrot.lane.b32.xlu2 %v47_v18, %s235_s16  ;;  %125 = vrot.lane.b32.xlu1 %v46_v19, %s235_s16 }
  0x33   :  { %123 = vrot.lane.b32.xlu0 %v45_v20, %s235_s16 }
  0x3a   :  { %133 = vrot.lane.b32.xlu2 %v50_v21, %s235_s16  ;;  %131 = vrot.lane.b32.xlu1 %v49_v22, %s235_s16 }
  0x3b   :  { %129 = vrot.lane.b32.xlu0 %v48_v23, %s235_s16 }
  0x5c   :  { %v72_v24 = vpop.permute.xlu2 %71 }
  0x5d   :  { %v152_v62 = vsel %vm147_vm0, %v19_v60, %v72_v24 }
  0x64   :  { %v74_v25 = vpop.permute.xlu2 %73 }
  0x65   :  { %v153_v37 = vsel %vm147_vm0, %v20_v36, %v74_v25 }
  0x6c   :  { %v80_v26 = vpop.permute.xlu2 %79 }
  0x6d   :  { %v156_v43 = vsel %vm147_vm0, %v23_v42, %v80_v26 }
  0x74   :  { %v86_v27 = vpop.permute.xlu2 %85  ;;  %v68_v28 = vpop.permute.xlu1 %67 }
  0x75   :  { %v64_v29 = vpop.permute.xlu0 %63  ;;  %v150_v31 = vsel %vm147_vm0, %v17_v30, %v68_v28  ;;  %v159_v51 = vsel %vm147_vm0, %v26_v48, %v86_v27 }
  0x76   :  { %v148_v55 = vsel %vm147_vm0, %v15_v50, %v64_v29 }
  0x7c   :  { %v116_v32 = vpop.permute.xlu2 %115  ;;  %v70_v33 = vpop.permute.xlu1 %69 }
  0x7d   :  { %v163_v34 = vsel %vm160_vm1, %v150_v31, %v116_v32  ;;  %v66_v35 = vpop.permute.xlu0 %65  ;;  %v151_v0 = vsel %vm147_vm0, %v18_v61, %v70_v33 }
  0x7e   :  { %175 = vst [vmem:[#allocation2 + $0x10] sm:$0xff] %v163_v34  ;;  %v149_v52 = vsel %vm147_vm0, %v16_v49, %v66_v35 }
  0x84   :  { %v122_v38 = vpop.permute.xlu2 %121  ;;  %v78_v39 = vpop.permute.xlu1 %77 }
  0x85   :  { %v166_v40 = vsel %vm160_vm1, %v153_v37, %v122_v38  ;;  %v76_v41 = vpop.permute.xlu0 %75  ;;  %v155_v6 = vsel %vm147_vm0, %v22_v4, %v78_v39 }
  0x86   :  { %178 = vst [vmem:[#allocation2 + $0x28] sm:$0xff] %v166_v40  ;;  %v154_v8 = vsel %vm147_vm0, %v21_v5, %v76_v41 }
  0x8c   :  { %v128_v44 = vpop.permute.xlu2 %127  ;;  %v84_v45 = vpop.permute.xlu1 %83 }
  0x8d   :  { %v169_v46 = vsel %vm160_vm1, %v156_v43, %v128_v44  ;;  %v82_v47 = vpop.permute.xlu0 %81  ;;  %v158_v14 = vsel %vm147_vm0, %v25_v12, %v84_v45 }
  0x8e   :  { %181 = vst [vmem:[#allocation2 + $0x40] sm:$0xff] %v169_v46  ;;  %v157_v16 = vsel %vm147_vm0, %v24_v13, %v82_v47 }
  0x94   :  { %v134_v53 = vpop.permute.xlu2 %133  ;;  %v114_v54 = vpop.permute.xlu1 %113 }
  0x95   :  { %v172_v56 = vsel %vm160_vm1, %v159_v51, %v134_v53  ;;  %v162_v57 = vsel %vm160_vm1, %v149_v52, %v114_v54  ;;  %v112_v58 = vpop.permute.xlu0 %111 }
  0x96   :  { %184 = vst [vmem:[#allocation2 + $0x58] sm:$0xff] %v172_v56  ;;  %v161_v59 = vsel %vm160_vm1, %v148_v55, %v112_v58 }
  0x97   :  { %174 = vst [vmem:[#allocation2 + $0x8] sm:$0xff] %v162_v57 }
  0x98   :  { %173 = vst [vmem:[#allocation2] sm:$0xff] %v161_v59 }
  0x9c   :  { %v120_v63 = vpop.permute.xlu1 %119 }
  0x9d   :  { %v165_v1 = vsel %vm160_vm1, %v152_v62, %v120_v63  ;;  %v118_v2 = vpop.permute.xlu0 %117 }
  0x9e   :  { %177 = vst [vmem:[#allocation2 + $0x20] sm:$0xff] %v165_v1  ;;  %v164_v3 = vsel %vm160_vm1, %v151_v0, %v118_v2 }
  0x9f   :  { %176 = vst [vmem:[#allocation2 + $0x18] sm:$0xff] %v164_v3 }
  0xa4   :  { %v126_v7 = vpop.permute.xlu1 %125 }
  0xa5   :  { %v168_v9 = vsel %vm160_vm1, %v155_v6, %v126_v7  ;;  %v124_v10 = vpop.permute.xlu0 %123 }
  0xa6   :  { %180 = vst [vmem:[#allocation2 + $0x38] sm:$0xff] %v168_v9  ;;  %v167_v11 = vsel %vm160_vm1, %v154_v8, %v124_v10 }
  0xa7   :  { %179 = vst [vmem:[#allocation2 + $0x30] sm:$0xff] %v167_v11 }
  0xac   :  { %v132_v15 = vpop.permute.xlu1 %131 }
  0xad   :  { %v171_v17 = vsel %vm160_vm1, %v158_v14, %v132_v15  ;;  %v130_v18 = vpop.permute.xlu0 %129 }
  0xae   :  { %183 = vst [vmem:[#allocation2 + $0x50] sm:$0xff] %v171_v17  ;;  %v170_v19 = vsel %vm160_vm1, %v157_v16, %v130_v18 }
  0xaf   :  { %182 = vst [vmem:[#allocation2 + $0x48] sm:$0xff] %v170_v19 }
  0xb0   :  { %197 = dma.vmem_to_hbm [thread:$0]  %s190_s28, 1536, %s192_s4, [#allocation3], %s237_s7, %s237_s7, %s238_s3  }
  0xb1   :  { %232 = dma.done.wait [#allocation3], 1536  }
  0xb2   :  { %233 = vsyncadd [#allocation3], 4294965760 }
  0xb3   :  { %202 = vsyncpa [#allocation3], 1 }

</bundles_post_ra>
